<compile_context>
chip_gen: v7x
topology: tpu7x:2x2x1
jax: 0.10.0
libtpu: 0.0.40
codegen_flags: <defaults>
</compile_context>

<pallas_src>
import functools

import jax
import jax.numpy as jnp
from jax.experimental import pallas as pl
from jax.experimental.pallas import tpu as pltpu


_LANES = 128


def _round_up(x, m):
    return ((x + m - 1) // m) * m


def _focal_kernel(x_ref, t_ref, w_ref, out_ref, *, alpha, gamma):
    x = x_ref[...]            # (TR, 128) f32 logits (lane-packed)
    t = t_ref[...]            # (TR, 128) f32 one-hot targets
    w = w_ref[...]            # (TR, 128) f32 size weights (0 on padding)

    # One shared transcendental for sigmoid + stable BCE.
    e = jnp.exp(-jnp.abs(x))
    inv = pl.reciprocal(1.0 + e)            # exact; approx=True is cheaper if looser tol OK
    p = jnp.where(x >= 0.0, inv, e * inv)   # sigmoid(x)

    pt = p * t + (1.0 - p) * (1.0 - t)
    alpha_t = alpha * t + (1.0 - alpha) * (1.0 - t)
    omp = 1.0 - pt
    if gamma == 2.0:                        # static (trace-time) branch on gamma
        mod = omp * omp
    elif gamma == 1.0:
        mod = omp
    elif gamma == 3.0:
        mod = omp * omp * omp
    else:                                   # non-integer gamma: fall back to pow
        mod = omp ** gamma

    # binary_cross_entropy_with_logits (numerically stable), reusing e.
    bce = jnp.maximum(x, 0.0) - x * t + jnp.log1p(e)

    loss = alpha_t * mod * bce * w
    # Single per-tile partial reduce in the epilogue of each step; lane-dense
    # (1, 128) row store, no carried scalar dependency across grid steps.
    out_ref[...] = jnp.sum(loss, axis=0, keepdims=True)


def _compute_size_weights(target_boxes, *, size_aware_weight, small_threshold,
                          weight_type):
    """Per-row size weights (tiny N-length op, kept outside the kernel)."""
    areas = target_boxes[:, 2] * target_boxes[:, 3]
    if weight_type == 'exponential':
        w = size_aware_weight * jnp.exp(-areas / small_threshold)
        return jnp.clip(w, 1.0, size_aware_weight)
    if weight_type == 'step':
        return jnp.where(areas <= small_threshold,
                         jnp.float32(size_aware_weight), jnp.float32(1.0))
    if weight_type == 'linear':
        na = jnp.clip(areas / (small_threshold * 3.0), 0.0, 1.0)
        return size_aware_weight * (1.0 - na) + 1.0
    raise ValueError(f'Unknown weight_type: {weight_type}')


def size_aware_focal_loss(pred, target, target_boxes, *,
                          alpha=0.25, gamma=2.0, size_aware_weight=2.0,
                          small_threshold=32 * 32, weight_type='exponential',
                          max_tile_rows=2048):
    """Pallas implementation of SizeAwareFocalLoss.forward."""
    N, C = pred.shape
    total = N * C

    w_row = _compute_size_weights(
        target_boxes.astype(jnp.float32),
        size_aware_weight=float(size_aware_weight),
        small_threshold=float(small_threshold),
        weight_type=weight_type).astype(jnp.float32)

    # Lane-dense flatten + pre-expansion of per-element target / weight.
    x_flat = pred.astype(jnp.float32).reshape(-1)
    t_flat = jax.nn.one_hot(target.astype(jnp.int32), C, dtype=jnp.float32).reshape(-1)
    w_flat = jnp.repeat(w_row, C)

    rows_needed = pl.cdiv(total, _LANES)
    tile_rows = min(int(max_tile_rows), _round_up(int(rows_needed), 8))
    padded_rows = _round_up(int(rows_needed), tile_rows)
    pad = padded_rows * _LANES - total
    if pad:
        # Padding gets weight 0 -> contributes exactly 0 to the sum.
        x_flat = jnp.pad(x_flat, (0, pad))
        t_flat = jnp.pad(t_flat, (0, pad))
        w_flat = jnp.pad(w_flat, (0, pad))

    x2 = x_flat.reshape(padded_rows, _LANES)
    t2 = t_flat.reshape(padded_rows, _LANES)
    w2 = w_flat.reshape(padded_rows, _LANES)
    num_tiles = padded_rows // tile_rows

    kernel = functools.partial(_focal_kernel, alpha=float(alpha), gamma=float(gamma))
    tile_spec = pl.BlockSpec((tile_rows, _LANES), lambda i: (i, 0))

    partials = pl.pallas_call(
        kernel,
        out_shape=jax.ShapeDtypeStruct((num_tiles, _LANES), jnp.float32),
        grid_spec=pltpu.PrefetchScalarGridSpec(
            num_scalar_prefetch=0,
            grid=(num_tiles,),
            in_specs=[tile_spec, tile_spec, tile_spec],
            out_specs=pl.BlockSpec((1, _LANES), lambda i: (i, 0)),
        ),
        compiler_params=pltpu.CompilerParams(
            dimension_semantics=("parallel",)),   # independent tiles -> v7x megacore
    )(x2, t2, w2)

    # Tree-reduce the tiny partials array; divide by the true N*C (padding is 0).
    return jnp.sum(partials) / total


def _reference(pred, target, target_boxes, *, alpha=0.25, gamma=2.0,
               size_aware_weight=2.0, small_threshold=32 * 32):
    """Pure-JAX reference mirroring the PyTorch forward exactly."""
    p = jax.nn.sigmoid(pred)
    areas = target_boxes[:, 2] * target_boxes[:, 3]
    w = jnp.clip(size_aware_weight * jnp.exp(-areas / small_threshold),
                 1.0, size_aware_weight)
    t = jax.nn.one_hot(target, pred.shape[1], dtype=jnp.float32)
    pt = p * t + (1 - p) * (1 - t)
    alpha_t = alpha * t + (1 - alpha) * (1 - t)
    focal_weight = alpha_t * (1 - pt) ** gamma
    bce = jnp.maximum(pred, 0) - pred * t + jnp.log1p(jnp.exp(-jnp.abs(pred)))
    return jnp.mean(focal_weight * bce * w[:, None])


if __name__ == "__main__":
    key = jax.random.PRNGKey(0)
    k1, k2, k3 = jax.random.split(key, 3)

    N, C = 16, 4
    pred = jax.random.normal(k1, (N, C), dtype=jnp.float32) * 2.0
    target = jax.random.randint(k2, (N,), 0, C, dtype=jnp.int32)
    # boxes (cx, cy, w, h); w,h in [1, 64] so some are "small", some are not
    wh = jax.random.uniform(k3, (N, 2), minval=1.0, maxval=64.0)
    cxy = jnp.full((N, 2), 100.0, dtype=jnp.float32)
    target_boxes = jnp.concatenate([cxy, wh], axis=1)

    loss = size_aware_focal_loss(pred, target, target_boxes)
    loss = jax.block_until_ready(loss)

    ref = _reference(pred, target, target_boxes)
    assert jnp.allclose(loss, ref, rtol=1e-5, atol=1e-6), (loss, ref)

    print("KERNEL_OK")
</pallas_src>

<mosaic_0001>
module attributes {stable_mosaic.version = 11 : i64} {
  func.func @_focal_kernel(%arg0: i32, %arg1: memref<8x128xf32, #tpu.memory_space<vmem>>, %arg2: memref<8x128xf32, #tpu.memory_space<vmem>>, %arg3: memref<8x128xf32, #tpu.memory_space<vmem>>, %arg4: memref<1x128xf32, #tpu.memory_space<vmem>>) attributes {dimension_semantics = [#tpu.dimension_semantics<parallel>], iteration_bounds = array<i64: 1>, scalar_prefetch = 0 : i64, scratch_operands = 0 : i64, tpu.core_type = #tpu.core_type<tc>, window_params = [{transform_indices = @transform_0, window_bounds = array<i64: 8, 128>}, {transform_indices = @transform_1, window_bounds = array<i64: 8, 128>}, {transform_indices = @transform_2, window_bounds = array<i64: 8, 128>}, {transform_indices = @transform_3, window_bounds = array<i64: 1, 128>}]} {
    %c0 = arith.constant 0 : index
    %c0_0 = arith.constant 0 : index
    %0 = vector.load %arg1[%c0, %c0_0] : memref<8x128xf32, #tpu.memory_space<vmem>>, vector<8x128xf32>
    %c0_1 = arith.constant 0 : index
    %c0_2 = arith.constant 0 : index
    %1 = vector.load %arg2[%c0_1, %c0_2] : memref<8x128xf32, #tpu.memory_space<vmem>>, vector<8x128xf32>
    %c0_3 = arith.constant 0 : index
    %c0_4 = arith.constant 0 : index
    %2 = vector.load %arg3[%c0_3, %c0_4] : memref<8x128xf32, #tpu.memory_space<vmem>>, vector<8x128xf32>
    %3 = math.absf %0 : vector<8x128xf32>
    %cst = arith.constant 0.000000e+00 : f32
    %4 = vector.broadcast %cst : f32 to vector<8x128xf32>
    %5 = arith.subf %4, %3 : vector<8x128xf32>
    %6 = math.exp %5 : vector<8x128xf32>
    %cst_5 = arith.constant 1.000000e+00 : f32
    %7 = vector.broadcast %cst_5 : f32 to vector<8x128xf32>
    %8 = arith.addf %7, %6 : vector<8x128xf32>
    %9 = tpu.reciprocal %8 : vector<8x128xf32> -> vector<8x128xf32>
    %cst_6 = arith.constant 0.000000e+00 : f32
    %10 = vector.broadcast %cst_6 : f32 to vector<8x128xf32>
    %11 = arith.cmpf oge, %0, %10 : vector<8x128xf32>
    %12 = arith.mulf %6, %9 : vector<8x128xf32>
    %13 = arith.select %11, %9, %12 : vector<8x128xi1>, vector<8x128xf32>
    %14 = arith.mulf %13, %1 : vector<8x128xf32>
    %cst_7 = arith.constant 1.000000e+00 : f32
    %15 = vector.broadcast %cst_7 : f32 to vector<8x128xf32>
    %16 = arith.subf %15, %13 : vector<8x128xf32>
    %cst_8 = arith.constant 1.000000e+00 : f32
    %17 = vector.broadcast %cst_8 : f32 to vector<8x128xf32>
    %18 = arith.subf %17, %1 : vector<8x128xf32>
    %19 = arith.mulf %16, %18 : vector<8x128xf32>
    %20 = arith.addf %14, %19 : vector<8x128xf32>
    %cst_9 = arith.constant 2.500000e-01 : f32
    %21 = vector.broadcast %cst_9 : f32 to vector<8x128xf32>
    %22 = arith.mulf %21, %1 : vector<8x128xf32>
    %cst_10 = arith.constant 1.000000e+00 : f32
    %23 = vector.broadcast %cst_10 : f32 to vector<8x128xf32>
    %24 = arith.subf %23, %1 : vector<8x128xf32>
    %cst_11 = arith.constant 7.500000e-01 : f32
    %25 = vector.broadcast %cst_11 : f32 to vector<8x128xf32>
    %26 = arith.mulf %25, %24 : vector<8x128xf32>
    %27 = arith.addf %22, %26 : vector<8x128xf32>
    %cst_12 = arith.constant 1.000000e+00 : f32
    %28 = vector.broadcast %cst_12 : f32 to vector<8x128xf32>
    %29 = arith.subf %28, %20 : vector<8x128xf32>
    %30 = arith.mulf %29, %29 : vector<8x128xf32>
    %cst_13 = arith.constant 0.000000e+00 : f32
    %31 = vector.broadcast %cst_13 : f32 to vector<8x128xf32>
    %32 = arith.maximumf %0, %31 : vector<8x128xf32>
    %33 = arith.mulf %0, %1 : vector<8x128xf32>
    %34 = arith.subf %32, %33 : vector<8x128xf32>
    %35 = math.log1p %6 : vector<8x128xf32>
    %36 = arith.addf %34, %35 : vector<8x128xf32>
    %37 = arith.mulf %27, %30 : vector<8x128xf32>
    %38 = arith.mulf %37, %36 : vector<8x128xf32>
    %39 = arith.mulf %38, %2 : vector<8x128xf32>
    %cst_14 = arith.constant dense<0.000000e+00> : vector<128xf32>
    %40 = vector.multi_reduction <add>, %39, %cst_14 [0] : vector<8x128xf32> to vector<128xf32>
    %41 = vector.shape_cast %40 : vector<128xf32> to vector<1x128xf32>
    %c0_15 = arith.constant 0 : index
    %c0_16 = arith.constant 0 : index
    %42 = vector.load %arg4[%c0_15, %c0_16] : memref<1x128xf32, #tpu.memory_space<vmem>>, vector<1x128xf32>
    tpu.vector_store %arg4[%c0_15, %c0_16], %41 {strides = array<i32>} : memref<1x128xf32, #tpu.memory_space<vmem>>, vector<1x128xf32>,
    return
  }
  func.func @transform_0(%arg0: i32) -> (i32, i32) {
    %c0_i32 = arith.constant 0 : i32
    %c0_i32_0 = arith.constant 0 : i32
    return %arg0, %c0_i32 : i32, i32
  }
  func.func @transform_1(%arg0: i32) -> (i32, i32) {
    %c0_i32 = arith.constant 0 : i32
    %c0_i32_0 = arith.constant 0 : i32
    return %arg0, %c0_i32 : i32, i32
  }
  func.func @transform_2(%arg0: i32) -> (i32, i32) {
    %c0_i32 = arith.constant 0 : i32
    %c0_i32_0 = arith.constant 0 : i32
    return %arg0, %c0_i32 : i32, i32
  }
  func.func @transform_3(%arg0: i32) -> (i32, i32) {
    %c0_i32 = arith.constant 0 : i32
    %c0_i32_0 = arith.constant 0 : i32
    return %arg0, %c0_i32 : i32, i32
  }
}

</mosaic_0001>

<bundles_post_ra>
// kernel: tpu_custom_call.1
= control target key start
LH: loop header
LB: loop body
LE: loop exit
PB: predicated region body
PF: predicated region fallthrough
CT: control target
= control target key end

     0   :  { %8 = vsyncpa [#allocation3], 0  ;;  %s287_s0 = inlined_call_operand.hbm [shape: f32[8,128], index: 0, kind: input, shape index: {}]   ;;  %s288_s1 = inlined_call_operand.hbm [shape: f32[8,128], index: 1, kind: input, shape index: {}]   ;;  %s289_s2 = inlined_call_operand.hbm [shape: f32[8,128], index: 2, kind: input, shape index: {}]   ;;  %s290_s3 = inlined_call_operand.hbm [shape: f32[1,128], index: 3, kind: output, shape index: {}]  }
   0x1   :  { %9 = vsyncpa [#allocation6], 0 }
   0x2   :  { %10 = vsyncpa [#allocation4], 0  ;;  %s215_s12 = smov [#allocation5]   ;;  %s216_s14 = smov [#allocation2]  }
   0x3   :  { %s27_s13 = sshll.u32 %s215_s12, 4  ;;  %s17_s15 = sshll.u32 %s216_s14, 4  ;;  %s28_s13 = int_to_ptr.vmem [resolvable:$true] %s27_s13  ;;  %s18_s15 = int_to_ptr.vmem [resolvable:$true] %s17_s15 }
   0x4   :  { %s121_s18 = scalar_lea.hbm %s288_s1, 128 }
   0x5   :  { %p122_p0 = scmp.ne.s32.totalorder %s288_s1, %s121_s18  ;;  %p125_p1 = scmp.lt.u32.totalorder %s121_s18, %s288_s1 }
   0x7   :  { %p127_p2 = pnand %p125_p1, %p122_p0 }
   0x9   :  { %130 = shalt.err (!%p127_p2)
}
   0xa   :  { %s131_s23 = scalar_lea.vmem %s28_s13, 128  ;;  %p136_p4 = scmp.lt.s32.totalorder %s28_s13, %s28_s13 }
   0xb   :  { %p132_p3 = scmp.ne.s32.totalorder %s28_s13, %s131_s23  ;;  %p137_p5 = scmp.lt.s32.totalorder %s131_s23, %s131_s23 }
   0xd   :  { %p138_p6 = por %p137_p5, %p136_p4 }
   0xf   :  { %p139_p7 = pnand %p138_p6, %p132_p3 }
  0x11   :  { %142 = shalt.err (!%p139_p7)
}
  0x12   :  { %30 = dma.hbm_to_vmem [thread:$0]  %s288_s1, 128, %s28_s13, [#allocation6]  }
  0x13   :  { %s143_s28 = scalar_lea.hbm %s287_s0, 128 }
  0x14   :  { %p144_p8 = scmp.ne.s32.totalorder %s287_s0, %s143_s28  ;;  %p147_p9 = scmp.lt.u32.totalorder %s143_s28, %s287_s0 }
  0x16   :  { %p149_p10 = pnand %p147_p9, %p144_p8 }
  0x18   :  { %152 = shalt.err (!%p149_p10)
}
  0x19   :  { %s153_s6 = scalar_lea.vmem %s18_s15, 128  ;;  %p158_p12 = scmp.lt.s32.totalorder %s18_s15, %s18_s15 }
  0x1a   :  { %p154_p11 = scmp.ne.s32.totalorder %s18_s15, %s153_s6  ;;  %p159_p13 = scmp.lt.s32.totalorder %s153_s6, %s153_s6 }
  0x1c   :  { %p160_p0 = por %p159_p13, %p158_p12 }
  0x1e   :  { %p161_p1 = pnand %p160_p0, %p154_p11 }
  0x20   :  { %164 = shalt.err (!%p161_p1)
}
  0x21   :  { %20 = dma.hbm_to_vmem [thread:$0]  %s287_s0, 128, %s18_s15, [#allocation3]  }
  0x22   :  { %s217_s8 = smov [#allocation7]   ;;  %s165_s12 = scalar_lea.hbm %s289_s2, 128 }
  0x23   :  { %s37_s9 = sshll.u32 %s217_s8, 4  ;;  %p166_p2 = scmp.ne.s32.totalorder %s289_s2, %s165_s12  ;;  %s38_s9 = int_to_ptr.vmem [resolvable:$true] %s37_s9 }
  0x24   :  { %p169_p3 = scmp.lt.u32.totalorder %s165_s12, %s289_s2 }
  0x26   :  { %p171_p4 = pnand %p169_p3, %p166_p2 }
  0x28   :  { %174 = shalt.err (!%p171_p4)
}
  0x29   :  { %s175_s18 = scalar_lea.vmem %s38_s9, 128  ;;  %p180_p6 = scmp.lt.s32.totalorder %s38_s9, %s38_s9 }
  0x2a   :  { %p176_p5 = scmp.ne.s32.totalorder %s38_s9, %s175_s18  ;;  %p181_p7 = scmp.lt.s32.totalorder %s175_s18, %s175_s18 }
  0x2c   :  { %p182_p8 = por %p181_p7, %p180_p6 }
  0x2e   :  { %p183_p9 = pnand %p182_p8, %p176_p5 }
  0x30   :  { %186 = shalt.err (!%p183_p9)
}
  0x31   :  { %40 = dma.hbm_to_vmem [thread:$0]  %s289_s2, 128, %s38_s9, [#allocation6]  }
  0x32   :  { %209 = dma.done.wait [#allocation3], 128  }
  0x33   :  { %210 = vsyncadd [#allocation3], 4294967168 }
  0x34   :  { %211 = dma.done.wait [#allocation6], 256  }
  0x35   :  { %212 = vsyncadd [#allocation6], 4294967040  ;;  %v50_v0 = vld [vmem:[#allocation2] sm:$0xff]  ;;  %v51_v7 = vld [vmem:[#allocation5] sm:$0xff]  ;;  %s218_s2 = smov [#allocation8]  }
  0x36   :  { %v53_v1 = vand.u32 2147483647, %v50_v0  ;;  %vm59_vm0 = vcmp.ge.f32.partialorder %v50_v0, 0.0  ;;  %v64_v12 = vsub.f32 1.0, %v51_v7  ;;  %v72_v17 = vmax.f32 %v50_v0, 0.0  ;;  %v52_v32 = vld [vmem:[#allocation7] sm:$0xff] }
  0x37   :  { %v73_v18 = vmul.f32 %v51_v7, %v50_v0  ;;  %v67_v22 = vmul.f32 0.25, %v51_v7  ;;  %s101_s19 = sshll.u32 %s218_s2, 4  ;;  %s102_s19 = int_to_ptr.vmem [resolvable:$true] %s101_s19 }
  0x38   :  { %v54_v2 = vsub.f32 0.0, %v53_v1  ;;  %v68_v23 = vmul.f32 0.75, %v64_v12  ;;  %s187_s20 = scalar_lea.vmem %s102_s19, 16  ;;  %s191_s21 = scalar_lea.vmem %s102_s19, 32 }
  0x39   :  { %v74_v25 = vsub.f32 %v72_v17, %v73_v18  ;;  %p188_p10 = scmp.ne.s32.totalorder %s102_s19, %s187_s20  ;;  %p192_p11 = scmp.lt.s32.totalorder %s102_s19, %s102_s19 }
  0x3a   :  { %v55_v3 = vmul.f32 1.442695, %v54_v2  ;;  %v69_v27 = vadd.f32 %v68_v23, %v67_v22  ;;  %p193_p12 = scmp.lt.s32.totalorder %s191_s21, %s187_s20 }
  0x3c   :  { %115 = vpow2.f32 %v55_v3  ;;  %p194_p13 = por %p193_p12, %p192_p11 }
  0x3e   :  { %p195_p0 = pnand %p194_p13, %p188_p10 }
  0x46   :  { %v116_v4 = vpop.eup %115 }
  0x47   :  { %v57_v5 = vadd.f32 1.0, %v116_v4  ;;  %v78_v6 = vmul.f32 -0.5, %v116_v4  ;;  %v81_v13 = vand.u32 2147483647, %v116_v4 }
  0x49   :  { %117 = vrcp.f32 %v57_v5  ;;  %v79_v10 = vadd.f32 1.0, %v78_v6  ;;  %vm82_vm1 = vcmp.lt.f32.partialorder %v81_v13, 0.0004427343 }
  0x4a   :  { %119 = vlog2.f32 %v57_v5 }
  0x4b   :  { %v80_v20 = vmul.f32 %v116_v4, %v79_v10 }
  0x53   :  { %v118_v8 = vpop.eup %117 }
  0x54   :  { %v60_v9 = vmul.f32 %v118_v8, %v116_v4  ;;  %v120_v11 = vpop.eup %119 }
  0x55   :  { %v77_v19 = vmul.f32 0.6931472, %v120_v11 }
  0x56   :  { %v61_v14 = vsel %vm59_vm0, %v118_v8, %v60_v9 }
  0x57   :  { %v62_v15 = vmul.f32 %v61_v14, %v51_v7  ;;  %v63_v16 = vsub.f32 1.0, %v61_v14  ;;  %v83_v26 = vsel %vm82_vm1, %v80_v20, %v77_v19 }
  0x58   :  { %v84_v30 = vadd.f32 %v83_v26, %v74_v25 }
  0x59   :  { %v65_v21 = vmul.f32 %v64_v12, %v63_v16 }
  0x5b   :  { %v66_v24 = vadd.f32 %v65_v21, %v62_v15 }
  0x5d   :  { %v70_v28 = vsub.f32 1.0, %v66_v24 }
  0x5f   :  { %v71_v29 = vmul.f32 %v70_v28, %v70_v28 }
  0x61   :  { %v85_v31 = vmul.f32 %v71_v29, %v69_v27 }
  0x63   :  { %v86_v33 = vmul.f32 %v85_v31, %v84_v30 }
  0x65   :  { %v87_v34 = vmul.f32 %v86_v33, %v52_v32 }
  0x67   :  { %v88_v35 = vrot.slane %v87_v34, 4 }
  0x69   :  { %v89_v36 = vadd.f32 %v88_v35, %v87_v34 }
  0x6b   :  { %v90_v37 = vrot.slane %v89_v36, 2 }
  0x6d   :  { %v91_v38 = vadd.f32 %v90_v37, %v89_v36 }
  0x6f   :  { %v92_v39 = vrot.slane %v91_v38, 1 }
  0x71   :  { %v93_v40 = vadd.f32 %v92_v39, %v91_v38 }
  0x73   :  { %94 = vst [vmem:[#allocation8] sm:$0x1] %v93_v40 }
  0x74   :  { %198 = shalt.err (!%p195_p0)
}
  0x75   :  { %s199_s24 = scalar_lea.hbm %s290_s3, 16 }
  0x76   :  { %p200_p1 = scmp.ne.s32.totalorder %s290_s3, %s199_s24  ;;  %p203_p2 = scmp.lt.u32.totalorder %s199_s24, %s290_s3 }
  0x78   :  { %p205_p3 = pnand %p203_p2, %p200_p1 }
  0x7a   :  { %208 = shalt.err (!%p205_p3)
}
  0x7b   :  { %104 = dma.vmem_to_hbm [thread:$0]  %s102_s19, 16, %s290_s3, [#allocation4]  }
  0x7c   :  { %213 = dma.done.wait [#allocation4], 16  }
  0x7d   :  { %214 = vsyncadd [#allocation4], 4294967280 }
  0x7e   :  { %108 = vsyncpa [#allocation3], 1 }
  0x7f   :  { %109 = vsyncpa [#allocation6], 1 }
  0x80   :  { %110 = vsyncpa [#allocation4], 1 }

</bundles_post_ra>
